<compile_context>
chip_gen: v7x
topology: tpu7x:2x2x1
jax: 0.10.0
libtpu: 0.0.40
codegen_flags: <defaults>
</compile_context>

<pallas_src>
import functools
import numpy as np
import jax
import jax.numpy as jnp
from jax.experimental import pallas as pl
from jax.experimental.pallas import tpu as pltpu


# -------------------------------------------------------------------------------------
# Fused kernel: agent.get_action_and_value + PPO minibatch loss / statistics.
# One grid step == one (epoch, minibatch) pair. Intermediates never leave vregs/VMEM.
# -------------------------------------------------------------------------------------
def ppo_fused_kernel(x_ref, act_ref, s_ref, w1t_ref, b1t_ref, wot_ref, bot_ref, out_ref, *,
                     n_actions, clip_coef, ent_coef, vf_coef, norm_adv, clip_vloss):
    # ---- Agent forward (transposed, lane-dense): obs^T -> tanh hidden^T -> [logits | value]^T
    xT = x_ref[...]                                                          # (D, MB)
    hT = jnp.tanh(jnp.dot(w1t_ref[...], xT, preferred_element_type=jnp.float32)
                  + b1t_ref[...])                                            # (H, MB)
    yT = jnp.dot(wot_ref[...], hT, preferred_element_type=jnp.float32) \
        + bot_ref[...]                                                       # (A+1, MB)
    logitsT = yT[:n_actions, :]                                              # (A, MB)
    newvalue = yT[n_actions:n_actions + 1, :]                                # (1, MB)

    # log-softmax over the action axis (sublanes)
    mx = jnp.max(logitsT, axis=0, keepdims=True)
    z = logitsT - mx
    lse = jnp.log(jnp.sum(jnp.exp(z), axis=0, keepdims=True))
    logp = z - lse                                                           # (A, MB)
    p = jnp.exp(logp)

    act = act_ref[...]                                                       # (1, MB) i32
    ids = jax.lax.broadcasted_iota(jnp.int32, logp.shape, 0)
    onehot = (ids == act).astype(jnp.float32)
    newlogprob = jnp.sum(onehot * logp, axis=0, keepdims=True)               # (1, MB)
    entropy = -jnp.sum(p * logp, axis=0, keepdims=True)                      # (1, MB)

    # ---- PPO minibatch loss / statistics
    olp = s_ref[0:1, :]
    adv = s_ref[1:2, :]
    ret = s_ref[2:3, :]
    val = s_ref[3:4, :]
    n = float(newlogprob.size)

    logratio = newlogprob - olp
    ratio = jnp.exp(logratio)
    old_approx_kl = jnp.sum(-logratio) / n
    approx_kl = jnp.sum(ratio - 1.0 - logratio) / n
    clipfrac = jnp.sum((jnp.abs(ratio - 1.0) > clip_coef).astype(jnp.float32)) / n

    if norm_adv:
        adv_mean = jnp.sum(adv) / n
        # torch.Tensor.std() is unbiased (N-1 denominator)
        adv_std = jnp.sqrt(jnp.sum((adv - adv_mean) ** 2) / (n - 1.0))
        adv = (adv - adv_mean) / (adv_std + 1e-8)

    pg_loss1 = -adv * ratio
    pg_loss2 = -adv * jnp.clip(ratio, 1.0 - clip_coef, 1.0 + clip_coef)
    pg_loss = jnp.sum(jnp.maximum(pg_loss1, pg_loss2)) / n

    if clip_vloss:
        v_loss_unclipped = (newvalue - ret) ** 2
        # NOTE: mirrors the reference EXACTLY: torch.clamp(x, clip_coef, clip_coef) == clip_coef
        # (min == max in the reference source), so v_clipped == values + clip_coef.
        v_clipped = val + jnp.clip(newvalue - val, clip_coef, clip_coef)
        v_loss_clipped = (v_clipped - ret) ** 2
        v_loss = 0.5 * jnp.sum(jnp.maximum(v_loss_unclipped, v_loss_clipped)) / n
    else:
        v_loss = 0.5 * jnp.sum((newvalue - ret) ** 2) / n

    entropy_loss = jnp.sum(entropy) / n
    loss = pg_loss - ent_coef * entropy_loss + vf_coef * v_loss

    # ---- Lane-dense stats tile: stat k broadcast along row k of an (8, 128) f32 block.
    rid = jax.lax.broadcasted_iota(jnp.int32, (8, 128), 0)
    res = jnp.zeros((8, 128), jnp.float32)
    for k, stat in enumerate((v_loss, pg_loss, entropy_loss, old_approx_kl,
                              approx_kl, clipfrac, loss)):
        res = jnp.where(rid == k, stat, res)
    out_ref[...] = res


# -------------------------------------------------------------------------------------
# One pallas_call for the whole epoch x minibatch grid. Stats pulled back once.
# -------------------------------------------------------------------------------------
@functools.partial(jax.jit,
                   static_argnames=("clip_coef", "ent_coef", "vf_coef", "norm_adv", "clip_vloss"))
def ppo_epochs(obs_t, act_p, streams_p, w1t, b1t, wot, bot, *,
               clip_coef, ent_coef, vf_coef, norm_adv, clip_vloss):
    E, n_mb, D, MB = obs_t.shape
    H = w1t.shape[0]
    A = wot.shape[0] - 1                       # merged [w2 | wv]^T head -> A action rows + 1 value row
    kern = functools.partial(ppo_fused_kernel, n_actions=A, clip_coef=clip_coef,
                             ent_coef=ent_coef, vf_coef=vf_coef,
                             norm_adv=norm_adv, clip_vloss=clip_vloss)
    return pl.pallas_call(
        kern,
        out_shape=jax.ShapeDtypeStruct((E, n_mb, 8, 128), jnp.float32),
        grid_spec=pltpu.PrefetchScalarGridSpec(
            num_scalar_prefetch=0,
            grid=(E, n_mb),
            in_specs=[
                pl.BlockSpec((None, None, D, MB), lambda e, m: (e, m, 0, 0)),   # obs^T
                pl.BlockSpec((None, None, 1, MB), lambda e, m: (e, m, 0, 0)),   # actions
                pl.BlockSpec((None, None, 4, MB), lambda e, m: (e, m, 0, 0)),   # logp/adv/ret/val
                pl.BlockSpec((H, D), lambda e, m: (0, 0)),                      # w1^T  (resident)
                pl.BlockSpec((H, 1), lambda e, m: (0, 0)),                      # b1^T
                pl.BlockSpec((A + 1, H), lambda e, m: (0, 0)),                  # [w2|wv]^T
                pl.BlockSpec((A + 1, 1), lambda e, m: (0, 0)),                  # [b2|bv]^T
            ],
            out_specs=pl.BlockSpec((None, None, 8, 128), lambda e, m: (e, m, 0, 0)),
        ),
        # Every (epoch, minibatch) step is data-independent (no in-kernel param update),
        # and output blocks are disjoint -> both axes can be split across v7x's 2 TCs.
        compiler_params=pltpu.CompilerParams(
            dimension_semantics=("parallel", "parallel")),
    )(obs_t, act_p, streams_p, w1t, b1t, wot, bot)


# -------------------------------------------------------------------------------------
# Learner.forward equivalent.
# -------------------------------------------------------------------------------------
def learner_forward(args, agent_params, buffer):
    obs_dim = buffer["observations"].shape[-1]
    B = args["batch_size"]
    MB = args["minibatch_size"]
    E = args["update_epochs"]
    n_mb = B // MB

    b_obs = buffer["observations"].reshape(-1, obs_dim).astype(jnp.float32)
    b_logprobs = buffer["logprobs"].reshape(-1).astype(jnp.float32)
    b_actions = buffer["actions"].reshape(-1).astype(jnp.int32)
    b_advantages = buffer["advantages"].reshape(-1).astype(jnp.float32)
    b_returns = buffer["returns"].reshape(-1).astype(jnp.float32)
    b_values = buffer["values"].reshape(-1).astype(jnp.float32)

    # Deterministic per-epoch shuffles (host), then ONE device gather for all epochs.
    rng = np.random.default_rng(0)
    inds = np.stack([rng.permutation(B) for _ in range(E)]).astype(np.int32)    # (E, B)
    inds_j = jnp.asarray(inds)

    obs_t = (jnp.take(b_obs, inds_j, axis=0)                                    # (E, B, D)
             .reshape(E, n_mb, MB, obs_dim)
             .transpose(0, 1, 3, 2))                                            # (E, n_mb, D, MB)
    act_p = jnp.take(b_actions, inds_j, axis=0).reshape(E, n_mb, 1, MB)

    def _perm(x):
        return jnp.take(x, inds_j, axis=0).reshape(E, n_mb, MB)

    streams_p = jnp.stack([_perm(b_logprobs), _perm(b_advantages),
                           _perm(b_returns), _perm(b_values)], axis=2)          # (E, n_mb, 4, MB)

    # Pre-transposed / merged agent params (policy + value head share one matmul).
    H = agent_params["w1"].shape[1]
    A = agent_params["w2"].shape[1]
    w1t = agent_params["w1"].T                                                  # (H, D)
    b1t = agent_params["b1"].reshape(H, 1)
    wot = jnp.concatenate([agent_params["w2"], agent_params["wv"]], axis=1).T   # (A+1, H)
    bot = jnp.concatenate([agent_params["b2"], agent_params["bv"]], axis=1).reshape(A + 1, 1)

    kw = dict(clip_coef=args["clip_coef"], ent_coef=args["ent_coef"], vf_coef=args["vf_coef"],
              norm_adv=args["norm_adv"], clip_vloss=args["clip_vloss"])

    if args["target_kl"] is None:
        # Single fused kernel over every epoch x minibatch: one dispatch, one host sync.
        stats = np.asarray(jax.block_until_ready(
            ppo_epochs(obs_t, act_p, streams_p, w1t, b1t, wot, bot, **kw)))[..., 0]
        flat = stats.reshape(E * n_mb, 8)
    else:
        # One fused call per epoch; a single host sync per epoch drives the KL early exit
        # (reference breaks after the offending epoch completes).
        rows = []
        for e in range(E):
            st = np.asarray(jax.block_until_ready(
                ppo_epochs(obs_t[e:e + 1], act_p[e:e + 1], streams_p[e:e + 1],
                           w1t, b1t, wot, bot, **kw)))[..., 0].reshape(n_mb, 8)
            rows.append(st)
            if float(st[-1, 4]) > args["target_kl"]:
                break
        flat = np.concatenate(rows, axis=0)

    # Reference semantics: scalar stats from the LAST processed minibatch; clipfrac mean over all.
    v_loss, pg_loss, entropy_loss, old_approx_kl, approx_kl = [float(v) for v in flat[-1, :5]]
    clipfracs = flat[:, 5]

    # TODO(synk): loss.backward(), nn.utils.clip_grad_norm_ and optimizer.step() require autodiff
    # + optimizer state; no Pallas forward-kernel equivalent implemented.

    y_pred = np.asarray(b_values)
    y_true = np.asarray(b_returns)
    var_y = np.var(y_true)
    explained_var = np.nan if var_y == 0 else 1.0 - np.var(y_true - y_pred) / var_y
    return (v_loss, pg_loss, entropy_loss, old_approx_kl, approx_kl,
            float(np.mean(clipfracs)), explained_var)


if __name__ == "__main__":
    num_steps, num_envs = 64, 8
    obs_dim, hidden, n_actions = 16, 32, 8
    batch_size = num_steps * num_envs                   # 512

    args = dict(batch_size=batch_size, minibatch_size=128, update_epochs=2,
                clip_coef=0.2, norm_adv=True, clip_vloss=True,
                ent_coef=0.01, vf_coef=0.5, target_kl=None)

    key = jax.random.PRNGKey(0)
    ks = jax.random.split(key, 10)
    buffer = {
        "observations": jax.random.normal(ks[0], (num_steps, num_envs, obs_dim), jnp.float32),
        "logprobs": -jnp.abs(jax.random.normal(ks[1], (num_steps, num_envs), jnp.float32)),
        "actions": jax.random.randint(ks[2], (num_steps, num_envs), 0, n_actions),
        "advantages": jax.random.normal(ks[3], (num_steps, num_envs), jnp.float32),
        "returns": jax.random.normal(ks[4], (num_steps, num_envs), jnp.float32),
        "values": jax.random.normal(ks[5], (num_steps, num_envs), jnp.float32),
    }
    agent_params = {
        "w1": 0.1 * jax.random.normal(ks[6], (obs_dim, hidden), jnp.float32),
        "b1": jnp.zeros((1, hidden), jnp.float32),
        "w2": 0.1 * jax.random.normal(ks[7], (hidden, n_actions), jnp.float32),
        "b2": jnp.zeros((1, n_actions), jnp.float32),
        "wv": 0.1 * jax.random.normal(ks[8], (hidden, 1), jnp.float32),
        "bv": jnp.zeros((1, 1), jnp.float32),
    }

    out = learner_forward(args, agent_params, buffer)   # blocks on device results internally
    assert all(np.isfinite(v) for v in out)
    print("KERNEL_OK")
</pallas_src>

<mosaic_0001>
module attributes {stable_mosaic.version = 11 : i64} {
  func.func @ppo_fused_kernel(%arg0: i32, %arg1: i32, %arg2: memref<1x1x16x128xf32, #tpu.memory_space<vmem>>, %arg3: memref<1x1x1x128xi32, #tpu.memory_space<vmem>>, %arg4: memref<1x1x4x128xf32, #tpu.memory_space<vmem>>, %arg5: memref<32x16xf32, #tpu.memory_space<vmem>>, %arg6: memref<32x1xf32, #tpu.memory_space<vmem>>, %arg7: memref<9x32xf32, #tpu.memory_space<vmem>>, %arg8: memref<9x1xf32, #tpu.memory_space<vmem>>, %arg9: memref<1x1x8x128xf32, #tpu.memory_space<vmem>>) attributes {dimension_semantics = [#tpu.dimension_semantics<parallel>, #tpu.dimension_semantics<parallel>], iteration_bounds = array<i64: 2, 4>, scalar_prefetch = 0 : i64, scratch_operands = 0 : i64, tpu.core_type = #tpu.core_type<tc>, window_params = [{transform_indices = @transform_0, window_bounds = array<i64: 1, 1, 16, 128>}, {transform_indices = @transform_1, window_bounds = array<i64: 1, 1, 1, 128>}, {transform_indices = @transform_2, window_bounds = array<i64: 1, 1, 4, 128>}, {pipeline_mode = #tpu.pipeline_mode<synchronous>, transform_indices = @transform_3, window_bounds = array<i64: 32, 16>}, {pipeline_mode = #tpu.pipeline_mode<synchronous>, transform_indices = @transform_4, window_bounds = array<i64: 32, 1>}, {pipeline_mode = #tpu.pipeline_mode<synchronous>, transform_indices = @transform_5, window_bounds = array<i64: 9, 32>}, {pipeline_mode = #tpu.pipeline_mode<synchronous>, transform_indices = @transform_6, window_bounds = array<i64: 9, 1>}, {transform_indices = @transform_7, window_bounds = array<i64: 1, 1, 8, 128>}]} {
    %c0 = arith.constant 0 : index
    %c0_0 = arith.constant 0 : index
    %c0_1 = arith.constant 0 : index
    %c0_2 = arith.constant 0 : index
    %0 = vector.load %arg2[%c0, %c0_0, %c0_1, %c0_2] : memref<1x1x16x128xf32, #tpu.memory_space<vmem>>, vector<1x1x16x128xf32>
    %1 = vector.shape_cast %0 : vector<1x1x16x128xf32> to vector<16x128xf32>
    %c0_3 = arith.constant 0 : index
    %c0_4 = arith.constant 0 : index
    %2 = vector.load %arg5[%c0_3, %c0_4] : memref<32x16xf32, #tpu.memory_space<vmem>>, vector<32x16xf32>
    %cst = arith.constant dense<0.000000e+00> : vector<32x128xf32>
    %3 = tpu.matmul %2, %1, %cst {dimension_numbers = #tpu.dot_dimension_numbers<[1], [0], [0], [1], [0, 0, 1, 1], [], []>} : vector<32x16xf32>, vector<16x128xf32>, vector<32x128xf32> -> vector<32x128xf32>
    %c0_5 = arith.constant 0 : index
    %c0_6 = arith.constant 0 : index
    %4 = vector.load %arg6[%c0_5, %c0_6] : memref<32x1xf32, #tpu.memory_space<vmem>>, vector<32x1xf32>
    %5 = vector.broadcast %4 : vector<32x1xf32> to vector<32x128xf32>
    %6 = arith.addf %3, %5 : vector<32x128xf32>
    %7 = math.tanh %6 : vector<32x128xf32>
    %c0_7 = arith.constant 0 : index
    %c0_8 = arith.constant 0 : index
    %8 = vector.load %arg7[%c0_7, %c0_8] : memref<9x32xf32, #tpu.memory_space<vmem>>, vector<9x32xf32>
    %cst_9 = arith.constant dense<0.000000e+00> : vector<9x128xf32>
    %9 = tpu.matmul %8, %7, %cst_9 {dimension_numbers = #tpu.dot_dimension_numbers<[1], [0], [0], [1], [0, 0, 1, 1], [], []>} : vector<9x32xf32>, vector<32x128xf32>, vector<9x128xf32> -> vector<9x128xf32>
    %c0_10 = arith.constant 0 : index
    %c0_11 = arith.constant 0 : index
    %10 = vector.load %arg8[%c0_10, %c0_11] : memref<9x1xf32, #tpu.memory_space<vmem>>, vector<9x1xf32>
    %11 = vector.broadcast %10 : vector<9x1xf32> to vector<9x128xf32>
    %12 = arith.addf %9, %11 : vector<9x128xf32>
    %13 = vector.extract_strided_slice %12 {offsets = [0, 0], sizes = [8, 128], strides = [1, 1]} : vector<9x128xf32> to vector<8x128xf32>
    %14 = vector.extract_strided_slice %12 {offsets = [8, 0], sizes = [1, 128], strides = [1, 1]} : vector<9x128xf32> to vector<1x128xf32>
    %cst_12 = arith.constant dense<0xFF800000> : vector<128xf32>
    %15 = vector.multi_reduction <maximumf>, %13, %cst_12 [0] : vector<8x128xf32> to vector<128xf32>
    %16 = vector.shape_cast %15 : vector<128xf32> to vector<1x128xf32>
    %17 = vector.broadcast %16 : vector<1x128xf32> to vector<8x128xf32>
    %18 = arith.subf %13, %17 : vector<8x128xf32>
    %19 = math.exp %18 : vector<8x128xf32>
    %cst_13 = arith.constant dense<0.000000e+00> : vector<128xf32>
    %20 = vector.multi_reduction <add>, %19, %cst_13 [0] : vector<8x128xf32> to vector<128xf32>
    %21 = vector.shape_cast %20 : vector<128xf32> to vector<1x128xf32>
    %22 = math.log %21 : vector<1x128xf32>
    %23 = vector.broadcast %22 : vector<1x128xf32> to vector<8x128xf32>
    %24 = arith.subf %18, %23 : vector<8x128xf32>
    %25 = math.exp %24 : vector<8x128xf32>
    %c0_14 = arith.constant 0 : index
    %c0_15 = arith.constant 0 : index
    %c0_16 = arith.constant 0 : index
    %c0_17 = arith.constant 0 : index
    %26 = vector.load %arg3[%c0_14, %c0_15, %c0_16, %c0_17] : memref<1x1x1x128xi32, #tpu.memory_space<vmem>>, vector<1x1x1x128xi32>
    %27 = vector.shape_cast %26 : vector<1x1x1x128xi32> to vector<1x128xi32>
    %28 = tpu.iota {dimensions = array<i32: 0>} : vector<8x128xi32>
    %29 = vector.broadcast %27 : vector<1x128xi32> to vector<8x128xi32>
    %30 = arith.cmpi eq, %28, %29 : vector<8x128xi32>
    %31 = arith.extui %30 : vector<8x128xi1> to vector<8x128xi32>
    %32 = arith.sitofp %31 : vector<8x128xi32> to vector<8x128xf32>
    %33 = arith.mulf %32, %24 : vector<8x128xf32>
    %cst_18 = arith.constant dense<0.000000e+00> : vector<128xf32>
    %34 = vector.multi_reduction <add>, %33, %cst_18 [0] : vector<8x128xf32> to vector<128xf32>
    %35 = vector.shape_cast %34 : vector<128xf32> to vector<1x128xf32>
    %36 = arith.mulf %25, %24 : vector<8x128xf32>
    %cst_19 = arith.constant dense<0.000000e+00> : vector<128xf32>
    %37 = vector.multi_reduction <add>, %36, %cst_19 [0] : vector<8x128xf32> to vector<128xf32>
    %38 = vector.shape_cast %37 : vector<128xf32> to vector<1x128xf32>
    %cst_20 = arith.constant 0.000000e+00 : f32
    %39 = vector.broadcast %cst_20 : f32 to vector<1x128xf32>
    %40 = arith.subf %39, %38 : vector<1x128xf32>
    %c0_21 = arith.constant 0 : index
    %c0_22 = arith.constant 0 : index
    %c0_23 = arith.constant 0 : index
    %c0_24 = arith.constant 0 : index
    %41 = vector.load %arg4[%c0_21, %c0_22, %c0_23, %c0_24] : memref<1x1x4x128xf32, #tpu.memory_space<vmem>>, vector<1x1x1x128xf32>
    %42 = vector.shape_cast %41 : vector<1x1x1x128xf32> to vector<1x128xf32>
    %c0_25 = arith.constant 0 : index
    %c0_26 = arith.constant 0 : index
    %c1 = arith.constant 1 : index
    %c0_27 = arith.constant 0 : index
    %43 = vector.load %arg4[%c0_25, %c0_26, %c1, %c0_27] : memref<1x1x4x128xf32, #tpu.memory_space<vmem>>, vector<1x1x1x128xf32>
    %44 = vector.shape_cast %43 : vector<1x1x1x128xf32> to vector<1x128xf32>
    %c0_28 = arith.constant 0 : index
    %c0_29 = arith.constant 0 : index
    %c2 = arith.constant 2 : index
    %c0_30 = arith.constant 0 : index
    %45 = vector.load %arg4[%c0_28, %c0_29, %c2, %c0_30] : memref<1x1x4x128xf32, #tpu.memory_space<vmem>>, vector<1x1x1x128xf32>
    %46 = vector.shape_cast %45 : vector<1x1x1x128xf32> to vector<1x128xf32>
    %c0_31 = arith.constant 0 : index
    %c0_32 = arith.constant 0 : index
    %c3 = arith.constant 3 : index
    %c0_33 = arith.constant 0 : index
    %47 = vector.load %arg4[%c0_31, %c0_32, %c3, %c0_33] : memref<1x1x4x128xf32, #tpu.memory_space<vmem>>, vector<1x1x1x128xf32>
    %48 = vector.shape_cast %47 : vector<1x1x1x128xf32> to vector<1x128xf32>
    %49 = arith.subf %35, %42 : vector<1x128xf32>
    %50 = math.exp %49 : vector<1x128xf32>
    %cst_34 = arith.constant 0.000000e+00 : f32
    %51 = vector.broadcast %cst_34 : f32 to vector<1x128xf32>
    %52 = arith.subf %51, %49 : vector<1x128xf32>
    %53 = vector.shape_cast %52 : vector<1x128xf32> to vector<1x1x128xf32>
    %cst_35 = arith.constant dense<0.000000e+00> : vector<1xf32>
    %54 = vector.multi_reduction <add>, %53, %cst_35 [1, 2] : vector<1x1x128xf32> to vector<1xf32>
    %55 = vector.shape_cast %54 : vector<1xf32> to vector<1x1x1xf32>
    %56 = vector.extract %55[0, 0, 0] : f32 from vector<1x1x1xf32>
    %cst_36 = arith.constant 1.280000e+02 : f32
    %57 = arith.divf %56, %cst_36 : f32
    %cst_37 = arith.constant 1.000000e+00 : f32
    %58 = vector.broadcast %cst_37 : f32 to vector<1x128xf32>
    %59 = arith.subf %50, %58 : vector<1x128xf32>
    %60 = arith.subf %59, %49 : vector<1x128xf32>
    %61 = vector.shape_cast %60 : vector<1x128xf32> to vector<1x1x128xf32>
    %cst_38 = arith.constant dense<0.000000e+00> : vector<1xf32>
    %62 = vector.multi_reduction <add>, %61, %cst_38 [1, 2] : vector<1x1x128xf32> to vector<1xf32>
    %63 = vector.shape_cast %62 : vector<1xf32> to vector<1x1x1xf32>
    %64 = vector.extract %63[0, 0, 0] : f32 from vector<1x1x1xf32>
    %cst_39 = arith.constant 1.280000e+02 : f32
    %65 = arith.divf %64, %cst_39 : f32
    %cst_40 = arith.constant 1.000000e+00 : f32
    %66 = vector.broadcast %cst_40 : f32 to vector<1x128xf32>
    %67 = arith.subf %50, %66 : vector<1x128xf32>
    %68 = math.absf %67 : vector<1x128xf32>
    %cst_41 = arith.constant 2.000000e-01 : f32
    %69 = vector.broadcast %cst_41 : f32 to vector<1x128xf32>
    %70 = arith.cmpf ogt, %68, %69 : vector<1x128xf32>
    %71 = arith.extui %70 : vector<1x128xi1> to vector<1x128xi32>
    %72 = arith.sitofp %71 : vector<1x128xi32> to vector<1x128xf32>
    %73 = vector.shape_cast %72 : vector<1x128xf32> to vector<1x1x128xf32>
    %cst_42 = arith.constant dense<0.000000e+00> : vector<1xf32>
    %74 = vector.multi_reduction <add>, %73, %cst_42 [1, 2] : vector<1x1x128xf32> to vector<1xf32>
    %75 = vector.shape_cast %74 : vector<1xf32> to vector<1x1x1xf32>
    %76 = vector.extract %75[0, 0, 0] : f32 from vector<1x1x1xf32>
    %cst_43 = arith.constant 1.280000e+02 : f32
    %77 = arith.divf %76, %cst_43 : f32
    %78 = vector.shape_cast %44 : vector<1x128xf32> to vector<1x1x128xf32>
    %cst_44 = arith.constant dense<0.000000e+00> : vector<1xf32>
    %79 = vector.multi_reduction <add>, %78, %cst_44 [1, 2] : vector<1x1x128xf32> to vector<1xf32>
    %80 = vector.shape_cast %79 : vector<1xf32> to vector<1x1x1xf32>
    %81 = vector.extract %80[0, 0, 0] : f32 from vector<1x1x1xf32>
    %cst_45 = arith.constant 1.280000e+02 : f32
    %82 = arith.divf %81, %cst_45 : f32
    %83 = vector.broadcast %82 : f32 to vector<1x128xf32>
    %84 = arith.subf %44, %83 : vector<1x128xf32>
    %85 = arith.mulf %84, %84 : vector<1x128xf32>
    %86 = vector.shape_cast %85 : vector<1x128xf32> to vector<1x1x128xf32>
    %cst_46 = arith.constant dense<0.000000e+00> : vector<1xf32>
    %87 = vector.multi_reduction <add>, %86, %cst_46 [1, 2] : vector<1x1x128xf32> to vector<1xf32>
    %88 = vector.shape_cast %87 : vector<1xf32> to vector<1x1x1xf32>
    %89 = vector.extract %88[0, 0, 0] : f32 from vector<1x1x1xf32>
    %cst_47 = arith.constant 1.270000e+02 : f32
    %90 = arith.divf %89, %cst_47 : f32
    %91 = math.sqrt %90 : f32
    %92 = vector.broadcast %82 : f32 to vector<1x128xf32>
    %93 = arith.subf %44, %92 : vector<1x128xf32>
    %cst_48 = arith.constant 9.99999993E-9 : f32
    %94 = arith.addf %91, %cst_48 : f32
    %95 = vector.broadcast %94 : f32 to vector<1x128xf32>
    %96 = arith.divf %93, %95 : vector<1x128xf32>
    %cst_49 = arith.constant 0.000000e+00 : f32
    %97 = vector.broadcast %cst_49 : f32 to vector<1x128xf32>
    %98 = arith.subf %97, %96 : vector<1x128xf32>
    %99 = arith.mulf %98, %50 : vector<1x128xf32>
    %cst_50 = arith.constant 0.000000e+00 : f32
    %100 = vector.broadcast %cst_50 : f32 to vector<1x128xf32>
    %101 = arith.subf %100, %96 : vector<1x128xf32>
    %cst_51 = arith.constant 8.000000e-01 : f32
    %cst_52 = arith.constant 1.200000e+00 : f32
    %102 = vector.broadcast %cst_51 : f32 to vector<1x128xf32>
    %103 = arith.maximumf %102, %50 : vector<1x128xf32>
    %104 = vector.broadcast %cst_52 : f32 to vector<1x128xf32>
    %105 = arith.minimumf %104, %103 : vector<1x128xf32>
    %106 = arith.mulf %101, %105 : vector<1x128xf32>
    %107 = arith.maximumf %99, %106 : vector<1x128xf32>
    %108 = vector.shape_cast %107 : vector<1x128xf32> to vector<1x1x128xf32>
    %cst_53 = arith.constant dense<0.000000e+00> : vector<1xf32>
    %109 = vector.multi_reduction <add>, %108, %cst_53 [1, 2] : vector<1x1x128xf32> to vector<1xf32>
    %110 = vector.shape_cast %109 : vector<1xf32> to vector<1x1x1xf32>
    %111 = vector.extract %110[0, 0, 0] : f32 from vector<1x1x1xf32>
    %cst_54 = arith.constant 1.280000e+02 : f32
    %112 = arith.divf %111, %cst_54 : f32
    %113 = arith.subf %14, %46 : vector<1x128xf32>
    %114 = arith.mulf %113, %113 : vector<1x128xf32>
    %115 = arith.subf %14, %48 : vector<1x128xf32>
    %cst_55 = arith.constant 2.000000e-01 : f32
    %cst_56 = arith.constant 2.000000e-01 : f32
    %116 = vector.broadcast %cst_55 : f32 to vector<1x128xf32>
    %117 = arith.maximumf %116, %115 : vector<1x128xf32>
    %118 = vector.broadcast %cst_56 : f32 to vector<1x128xf32>
    %119 = arith.minimumf %118, %117 : vector<1x128xf32>
    %120 = arith.addf %48, %119 : vector<1x128xf32>
    %121 = arith.subf %120, %46 : vector<1x128xf32>
    %122 = arith.mulf %121, %121 : vector<1x128xf32>
    %123 = arith.maximumf %114, %122 : vector<1x128xf32>
    %124 = vector.shape_cast %123 : vector<1x128xf32> to vector<1x1x128xf32>
    %cst_57 = arith.constant dense<0.000000e+00> : vector<1xf32>
    %125 = vector.multi_reduction <add>, %124, %cst_57 [1, 2] : vector<1x1x128xf32> to vector<1xf32>
    %126 = vector.shape_cast %125 : vector<1xf32> to vector<1x1x1xf32>
    %127 = vector.extract %126[0, 0, 0] : f32 from vector<1x1x1xf32>
    %cst_58 = arith.constant 5.000000e-01 : f32
    %128 = arith.mulf %cst_58, %127 : f32
    %cst_59 = arith.constant 1.280000e+02 : f32
    %129 = arith.divf %128, %cst_59 : f32
    %130 = vector.shape_cast %40 : vector<1x128xf32> to vector<1x1x128xf32>
    %cst_60 = arith.constant dense<0.000000e+00> : vector<1xf32>
    %131 = vector.multi_reduction <add>, %130, %cst_60 [1, 2] : vector<1x1x128xf32> to vector<1xf32>
    %132 = vector.shape_cast %131 : vector<1xf32> to vector<1x1x1xf32>
    %133 = vector.extract %132[0, 0, 0] : f32 from vector<1x1x1xf32>
    %cst_61 = arith.constant 1.280000e+02 : f32
    %134 = arith.divf %133, %cst_61 : f32
    %cst_62 = arith.constant 0.00999999977 : f32
    %135 = arith.mulf %cst_62, %134 : f32
    %136 = arith.subf %112, %135 : f32
    %cst_63 = arith.constant 5.000000e-01 : f32
    %137 = arith.mulf %cst_63, %129 : f32
    %138 = arith.addf %136, %137 : f32
    %139 = tpu.iota {dimensions = array<i32: 0>} : vector<8x128xi32>
    %cst_64 = arith.constant 0.000000e+00 : f32
    %140 = vector.broadcast %cst_64 : f32 to vector<8x128xf32>
    %c0_i32 = arith.constant 0 : i32
    %141 = vector.broadcast %c0_i32 : i32 to vector<8x128xi32>
    %142 = arith.cmpi eq, %139, %141 : vector<8x128xi32>
    %143 = vector.broadcast %129 : f32 to vector<8x128xf32>
    %144 = arith.select %142, %143, %140 : vector<8x128xi1>, vector<8x128xf32>
    %c1_i32 = arith.constant 1 : i32
    %145 = vector.broadcast %c1_i32 : i32 to vector<8x128xi32>
    %146 = arith.cmpi eq, %139, %145 : vector<8x128xi32>
    %147 = vector.broadcast %112 : f32 to vector<8x128xf32>
    %148 = arith.select %146, %147, %144 : vector<8x128xi1>, vector<8x128xf32>
    %c2_i32 = arith.constant 2 : i32
    %149 = vector.broadcast %c2_i32 : i32 to vector<8x128xi32>
    %150 = arith.cmpi eq, %139, %149 : vector<8x128xi32>
    %151 = vector.broadcast %134 : f32 to vector<8x128xf32>
    %152 = arith.select %150, %151, %148 : vector<8x128xi1>, vector<8x128xf32>
    %c3_i32 = arith.constant 3 : i32
    %153 = vector.broadcast %c3_i32 : i32 to vector<8x128xi32>
    %154 = arith.cmpi eq, %139, %153 : vector<8x128xi32>
    %155 = vector.broadcast %57 : f32 to vector<8x128xf32>
    %156 = arith.select %154, %155, %152 : vector<8x128xi1>, vector<8x128xf32>
    %c4_i32 = arith.constant 4 : i32
    %157 = vector.broadcast %c4_i32 : i32 to vector<8x128xi32>
    %158 = arith.cmpi eq, %139, %157 : vector<8x128xi32>
    %159 = vector.broadcast %65 : f32 to vector<8x128xf32>
    %160 = arith.select %158, %159, %156 : vector<8x128xi1>, vector<8x128xf32>
    %c5_i32 = arith.constant 5 : i32
    %161 = vector.broadcast %c5_i32 : i32 to vector<8x128xi32>
    %162 = arith.cmpi eq, %139, %161 : vector<8x128xi32>
    %163 = vector.broadcast %77 : f32 to vector<8x128xf32>
    %164 = arith.select %162, %163, %160 : vector<8x128xi1>, vector<8x128xf32>
    %c6_i32 = arith.constant 6 : i32
    %165 = vector.broadcast %c6_i32 : i32 to vector<8x128xi32>
    %166 = arith.cmpi eq, %139, %165 : vector<8x128xi32>
    %167 = vector.broadcast %138 : f32 to vector<8x128xf32>
    %168 = arith.select %166, %167, %164 : vector<8x128xi1>, vector<8x128xf32>
    %c0_65 = arith.constant 0 : index
    %c0_66 = arith.constant 0 : index
    %c0_67 = arith.constant 0 : index
    %c0_68 = arith.constant 0 : index
    %169 = vector.load %arg9[%c0_65, %c0_66, %c0_67, %c0_68] : memref<1x1x8x128xf32, #tpu.memory_space<vmem>>, vector<1x1x8x128xf32>
    %170 = vector.shape_cast %169 : vector<1x1x8x128xf32> to vector<8x128xf32>
    %171 = vector.shape_cast %168 : vector<8x128xf32> to vector<1x1x8x128xf32>
    tpu.vector_store %arg9[%c0_65, %c0_66, %c0_67, %c0_68], %171 {strides = array<i32>} : memref<1x1x8x128xf32, #tpu.memory_space<vmem>>, vector<1x1x8x128xf32>,
    return
  }
  func.func @transform_0(%arg0: i32, %arg1: i32) -> (i32, i32, i32, i32) {
    %c0_i32 = arith.constant 0 : i32
    %c0_i32_0 = arith.constant 0 : i32
    %c0_i32_1 = arith.constant 0 : i32
    return %arg0, %arg1, %c0_i32, %c0_i32_0 : i32, i32, i32, i32
  }
  func.func @transform_1(%arg0: i32, %arg1: i32) -> (i32, i32, i32, i32) {
    %c0_i32 = arith.constant 0 : i32
    %c0_i32_0 = arith.constant 0 : i32
    %c0_i32_1 = arith.constant 0 : i32
    return %arg0, %arg1, %c0_i32, %c0_i32_0 : i32, i32, i32, i32
  }
  func.func @transform_2(%arg0: i32, %arg1: i32) -> (i32, i32, i32, i32) {
    %c0_i32 = arith.constant 0 : i32
    %c0_i32_0 = arith.constant 0 : i32
    %c0_i32_1 = arith.constant 0 : i32
    return %arg0, %arg1, %c0_i32, %c0_i32_0 : i32, i32, i32, i32
  }
  func.func @transform_3(%arg0: i32, %arg1: i32) -> (i32, i32) {
    %c0_i32 = arith.constant 0 : i32
    %c0_i32_0 = arith.constant 0 : i32
    %c0_i32_1 = arith.constant 0 : i32
    return %c0_i32, %c0_i32_0 : i32, i32
  }
  func.func @transform_4(%arg0: i32, %arg1: i32) -> (i32, i32) {
    %c0_i32 = arith.constant 0 : i32
    %c0_i32_0 = arith.constant 0 : i32
    %c0_i32_1 = arith.constant 0 : i32
    return %c0_i32, %c0_i32_0 : i32, i32
  }
  func.func @transform_5(%arg0: i32, %arg1: i32) -> (i32, i32) {
    %c0_i32 = arith.constant 0 : i32
    %c0_i32_0 = arith.constant 0 : i32
    %c0_i32_1 = arith.constant 0 : i32
    return %c0_i32, %c0_i32_0 : i32, i32
  }
  func.func @transform_6(%arg0: i32, %arg1: i32) -> (i32, i32) {
    %c0_i32 = arith.constant 0 : i32
    %c0_i32_0 = arith.constant 0 : i32
    %c0_i32_1 = arith.constant 0 : i32
    return %c0_i32, %c0_i32_0 : i32, i32
  }
  func.func @transform_7(%arg0: i32, %arg1: i32) -> (i32, i32, i32, i32) {
    %c0_i32 = arith.constant 0 : i32
    %c0_i32_0 = arith.constant 0 : i32
    %c0_i32_1 = arith.constant 0 : i32
    return %arg0, %arg1, %c0_i32, %c0_i32_0 : i32, i32, i32, i32
  }
}

</mosaic_0001>

<bundles_post_ra>
// kernel: ppo_epochs.1
= control target key start
LH: loop header
LB: loop body
LE: loop exit
PB: predicated region body
PF: predicated region fallthrough
CT: control target
= control target key end

     0   :  { %s1627_s0 = inlined_call_operand.hbm [shape: f32[2,4,16,128], index: 0, kind: input, shape index: {}]   ;;  %s1628_s1 = inlined_call_operand.vmem [shape: s32[2,4,1,128], index: 1, kind: input, shape index: {}]   ;;  %s1629_s2 = inlined_call_operand.vmem [shape: f32[2,4,4,128], index: 2, kind: input, shape index: {}]   ;;  %s1630_s3 = inlined_call_operand.vmem [shape: f32[32,16], index: 3, kind: input, shape index: {}]   ;;  %s1631_s4 = inlined_call_operand.vmem [shape: f32[32,1], index: 4, kind: input, shape index: {}]   ;;  %s1632_s5 = inlined_call_operand.vmem [shape: f32[9,32], index: 5, kind: input, shape index: {}]   ;;  %s1633_s6 = inlined_call_operand.vmem [shape: f32[9,1], index: 6, kind: input, shape index: {}]   ;;  %s1634_s7 = inlined_call_operand.hbm [shape: f32[2,4,8,128], index: 7, kind: output, shape index: {}]  }
   0x1   :  { %1640 = sst [smem:[#allocation11_spill]] %s1627_s0 }
   0x2   :  { %1641 = sst [smem:[#allocation12_spill]] %s1629_s2 }
   0x3   :  { %1642 = sst [smem:[#allocation13_spill]] %s1634_s7 }
   0x4   :  { %12 = vsyncpa [#allocation3], 0 }
   0x5   :  { %14 = vsyncpa [#allocation3 + $0x1], 0 }
   0x6   :  { %15 = vsyncpa [#allocation4], 0 }
   0x7   :  { %17 = vsyncpa [#allocation4 + $0x1], 0  ;;  %s1331_s24 = smov 0   ;;  %s1333_s25 = smov 0  }
   0x8   :  { %s1335_s26 = smov 0   ;;  %s1337_s27 = smov 0  }
   0x9   :  { %s1339_s28 = smov 0   ;;  %s1341_s29 = smov 0  }
   0xa   :  { %s1343_s30 = smov 0   ;;  %s1345_s8 = smov 0  }
   0xb LB: > { %1643 = sst [smem:[#allocation8_spill]] %s1255_s24  ;;  %s959_s9 = sadd.s32 4294967295, %s1283_s8   ;;  %s1283_s8 = sphi %s1345_s8, %s23_s8   ;;  %s1279_s30 = sphi %s1343_s30, %s1665_s30   ;;  %s1275_s29 = sphi %s1341_s29, %s1664_s29   ;;  %s1271_s28 = sphi %s1339_s28, %s1663_s28   ;;  %s1267_s27 = sphi %s1337_s27, %s1662_s27   ;;  %s1263_s26 = sphi %s1335_s26, %s1661_s26   ;;  %s1259_s25 = sphi %s1333_s25, %s1660_s25   ;;  %s1255_s24 = sphi %s1331_s24, %s1659_s24  }
   0xc   : > { %s960_s10 = sadd.s32 4294967294, %s1283_s8   ;;  %s32_s11 = sadd.s32 1, %s1275_s29 }
   0xd   : > { %s35_s12 = sadd.s32 1, %s1279_s30  ;;  %p33_p0 = scmp.ge.s32.totalorder %s32_s11, 4 }
   0xe   : > { %s44_s13 = sadd.s32 1, %s1263_s26  ;;  %p51_p1 = scmp.ne.s32.totalorder %s1263_s26, %s1259_s25 }
   0xf   : > { %p52_p2 = scmp.eq.s32.totalorder %s1283_s8, 0  ;;  %s1667_s11 = smov (%p33_p0, %s32_s11), 0 }
  0x10   : > { %1644 = sst [smem:[#allocation9_spill]] %s1667_s11  ;;  %s1669_s12 = smov (!%p33_p0, %s35_s12), %s1279_s30 }
  0x11   : > { %s40_s14 = ssub.s32 %s1275_s29, %s1667_s11  ;;  %p1384_p3 = por %p52_p2, %p51_p1 }
  0x12   : > { %p37_p4 = scmp.ge.s32.totalorder %s1669_s12, 2  ;;  %p57_p5 = scmp.ne.s32.totalorder %s1259_s25, %s1255_s24 }
  0x13   : > { %p58_p6 = scmp.eq.s32.totalorder %s959_s9, 0  ;;  %p223_p7 = scmp.eq.s32.totalorder %s959_s9, 7 }
  0x14   : > { %s1671_s12 = smov (%p37_p4, %s1669_s12), 0  ;;  %p229_p10 = scmp.eq.s32.totalorder %s960_s10, 7 }
  0x15   : > { %1646 = sst [smem:[#allocation10_spill]] %s1671_s12  ;;  %p1392_p8 = por %p58_p6, %p57_p5 }
  0x16   : > { %p1396_p9 = por %p223_p7, %p51_p1  ;;  %s39_s18 = ssub.s32 %s1279_s30, %s1671_s12 }
  0x17   : > { %s41_s19 = sor.u32 %s40_s14, %s39_s18  ;;  %p1402_p12 = por %p229_p10, %p57_p5 }
  0x18   : > { %s1648_s17 = scalar_select %p1396_p9, 1, 0 }
  0x19   : > { %p42_p11 = scmp.eq.s32.totalorder %s41_s19, 0  ;;  %p1063_p13 = scmp.lt.s32.totalorder %s1283_s8, 8 }
  0x1a   : > { %s1649_s20 = scalar_select %p1402_p12, 1, 0 }
  0x1b   : > { %s261_s21 = sand.u32 1, %s1263_s26   ;;  %s964_s9 = sshll.u32 %s1275_s29, 1 }
  0x1c   : > { %s1409_s22 = scalar_select %p42_p11, %s1263_s26, %s44_s13  }
  0x1d   : > { %s963_s23 = sshll.u32 %s261_s21, 4  ;;  %s965_s11 = sshll.u32 %s1279_s30, 3 }
  0x1e   : > { %s265_s24 = scalar_lea.vmem [#allocation2], %s963_s23  ;;  %s271_s2 = sadd.s32 %s965_s11, %s964_s9 }
  0x1f   : > { %s274_s7 = sshll.u32 %s265_s24, 4  ;;  %s966_s12 = sshll.u32 %s271_s2, 7  ;;  %s1413_s7 = int_to_ptr.vmem [resolvable:$true] %s274_s7 }
  0x20   : > { %p1417_p0 = pnand %p1063_p13, %p1384_p3  ;;  %s1651_s0 = sld [smem:[#allocation11_spill]] }
  0x21   : > { %s1426_s24 = scalar_lea.sflag [#allocation3], %s261_s21 }
  0x22   : > { %p1157_p2 = pneg %p1417_p0 }
  0x26   : > { %s1424_s13 = scalar_lea.hbm %s1651_s0, %s966_s12  ;;  %s1160_s19 = scalar_lea.hbm %s1651_s0, 2048 }
  0x27   : > { %s1155_s11 = scalar_lea.hbm %s1424_s13, 256  ;;  %p1161_p5 = scmp.lt.u32.totalorder %s1424_s13, %s1651_s0 }
  0x28   : > { %p1156_p1 = scmp.ne.s32.totalorder %s1424_s13, %s1155_s11  ;;  %p1162_p6 = scmp.lt.u32.totalorder %s1160_s19, %s1155_s11 }
  0x29   : > { %p1164_p10 = scmp.lt.u32.totalorder %s1155_s11, %s1424_s13 }
  0x2a   : > { %p1158_p3 = pnand %p1157_p2, %p1156_p1  ;;  %p1163_p7 = por %p1162_p6, %p1161_p5 }
  0x2c   : > { %p1159_p4 = pneg %p1158_p3  ;;  %p1165_p11 = por %p1164_p10, %p1163_p7 }
  0x2e   : > { %p1166_p13 = pnand %p1165_p11, %p1159_p4 }
  0x30   : > { %1169 = shalt.err (!%p1166_p13)
}
  0x31   : > { %s1170_s21 = scalar_lea.vmem %s1413_s7, 256  ;;  %s1285_s9 = smov [#allocation2]  }
  0x32   : > { %p1171_p1 = scmp.ne.s32.totalorder %s1413_s7, %s1170_s21  ;;  %s1175_s14 = sshll.u32 %s1285_s9, 4  ;;  %s1176_s14 = int_to_ptr.vmem [resolvable:$false] %s1175_s14 }
  0x33   : > { %s1177_s18 = scalar_lea.vmem %s1176_s14, 512  ;;  %p1178_p9 = scmp.lt.s32.totalorder %s1413_s7, %s1176_s14 }
  0x34   : > { %p1173_p3 = pnand %p1171_p1, %p1157_p2  ;;  %p1179_p5 = scmp.lt.s32.totalorder %s1177_s18, %s1170_s21 }
  0x36   : > { %p1174_p12 = pneg %p1173_p3  ;;  %p1180_p6 = por %p1179_p5, %p1178_p9 }
  0x38   : > { %p1181_p7 = pnand %p1180_p6, %p1174_p12 }
  0x3a   : > { %1184 = shalt.err (!%p1181_p7)
}
  0x3b   : > { %s1286_s11 = smov 128   ;;  %s1287_s2 = smov 8  }
  0x3c   : > { %1058 = dma.hbm_to_vmem [thread:$0]  (!%p1417_p0), %s1424_s13, 256, %s1413_s7, %s1426_s24, %s1286_s11, %s1286_s11, %s1287_s2  }
  0x3d   : > { %p967_p2 = scmp.ge.s32.totalorder %s1283_s8, 1  ;;  %p303_p4 = scmp.lt.s32.totalorder %s1283_s8, 9 }
  0x3f   : > { %p304_p10 = pnand %p967_p2, %p303_p4 }
  0x40   : > { %s1457_s15 = sand.u32 (!%p304_p10), 1, %s1259_s25  }
  0x41   : > { %307 = sbr.rel (%p304_p10) target bundleno = 1365 (0x555), region = 48  ;;  %s968_s19 = sshll.u32 (!%p304_p10), %s1457_s15, 4 }
  0x42   : > { %s310_s12 = scalar_lea.sflag (!%p304_p10), [#allocation3], %s1457_s15  ;;  %s313_s23 = scalar_lea.vmem (!%p304_p10), [#allocation2], %s968_s19 }
  0x48   : > { %1246 = dma.done.wait (%p1392_p8), %s310_s12, 256  }
  0x49   : > { %1248 = vsyncadd (%p1392_p8), %s310_s12, 4294967040  ;;  %v1288_v0 = vmov 0   ;;  %vm404_vm0 = vcmask 130048   ;;  %v374_v1 = vld [vmem:[%s313_s23] sm:$0xff]  ;;  %v375_v2 = vld [vmem:[%s313_s23 + $0x8] sm:$0xff]  ;;  %vm520_vm1 = vcmask 261120   ;;  %v623_v52 = vlaneseq }
  0x4a   : > { %1133 = vset.pattern.permute.xlu0 %v1288_v0  ;;  %1134 = vset.pattern.permute.xlu1 %v1288_v0  ;;  %v376_v3 = vld [vmem:[%s1630_s3] sm:$0xff]  ;;  %v1021_v4 = vpack.c.bf16 %v375_v2, %v374_v1  ;;  %v382_v6 = vld [vmem:[%s1631_s4 + $0x10] sm:$0xff]  ;;  %v377_v7 = vld [vmem:[%s1630_s3 + $0x8] sm:$0xff]  ;;  %p359_p8 = scmp.lt.s32.totalorder %s1271_s28, 1  ;;  %p361_p9 = scmp.lt.s32.totalorder %s1267_s27, 3  ;;  %v1289_v57 = vmov 0.0  }
  0x4b   : > { %1004 = vmatprep.mubr.msk.f32.mxu0 %vm404_vm0, %v376_v3  ;;  %v380_v5 = vld [vmem:[%s1631_s4] sm:$0xff]  ;;  %v381_v8 = vld [vmem:[%s1631_s4 + $0x8] sm:$0xff]  ;;  %396 = vperm.xlu1 %1134, %v382_v6   ;;  %v378_v9 = vld [vmem:[%s1630_s3 + $0x10] sm:$0xff]  ;;  %v1513_v53 = vshrl.u32 %v623_v52, 7  ;;  %s1652_s21 = sld [smem:[#allocation12_spill]]  ;;  %vm655_vm3 = vcmask 1040384  }
  0x4c   : > { %1022 = vmatprep.subr.bf16.mxu0 %v1021_v4  ;;  %386 = vperm.xlu0 %1133, %v380_v5   ;;  %v383_v10 = vld [vmem:[%s1631_s4 + $0x18] sm:$0xff]  ;;  %v508_v12 = vld [vmem:[%s1633_s6] sm:$0xff]  ;;  %v507_v32 = vld [vmem:[%s1632_s5 + $0x8] sm:$0x1]  ;;  %s360_s18 = scalar_select %p359_p8, %s1271_s28, 1 }
  0x4d   : > { %1024 = vmatpush3.bf16.msra.mxu0 %v1021_v4  ;;  %v379_v11 = vld [vmem:[%s1630_s3 + $0x18] sm:$0xff]  ;;  %v506_v13 = vld [vmem:[%s1632_s5] sm:$0xff]  ;;  %s362_s11 = scalar_select %p361_p9, %s1267_s27, 3  ;;  %vm802_vm7 = vcmp.eq.s32.totalorder %v1513_v53, 0  ;;  %vm805_vm8 = vcmp.eq.s32.totalorder %v1513_v53, 1  ;;  %vm808_vm9 = vcmp.eq.s32.totalorder %v1513_v53, 2 }
  0x4e   : > { %1018 = vmatprep.mubr.msk.f32.mxu1 %vm520_vm1, %v506_v13  ;;  %s970_s2 = sshll.u32 %s360_s18, 2  ;;  %vm811_vm10 = vcmp.eq.s32.totalorder %v1513_v53, 3  ;;  %vm814_vm11 = vcmp.eq.s32.totalorder %v1513_v53, 4  ;;  %vm817_vm12 = vcmp.eq.s32.totalorder %v1513_v53, 5  ;;  %vm820_vm13 = vcmp.eq.s32.totalorder %v1513_v53, 6  ;;  %p1654_p0 = scmp.ne.s32.totalorder %s1648_s17, 0 }
  0x4f   : > { %401 = vperm.xlu1 %1134, %v383_v10   ;;  %s364_s19 = sadd.s32 %s970_s2, %s362_s11 }
  0x50   : > { %1005 = vmatmul.mubr.msk.f32.vlgmr.msra.gmra.mrb[0].mxu0 %vm404_vm0, %v377_v7  ;;  %391 = vperm.xlu0 %1133, %v381_v8   ;;  %s365_s7 = scalar_lea.vmem %s1628_s1, %s364_s19  ;;  %s972_s10 = sshll.u32 %s364_s19, 2 }
  0x51   : > { %1007 = vmatprep.mubr.msk.f32.mxu0 %vm404_vm0, %v378_v9  ;;  %v979_v54 = vld [vmem:[%s365_s7] ss:$0 sm:$0xff]  ;;  %s1522_s16 = scalar_lea.vmem %s1652_s21, %s972_s10 }
  0x52   : > { %vm629_vm2 = vcmp.eq.s32.totalorder %v1513_v53, %v979_v54  ;;  %v647_v2 = vld [vmem:[%s1522_s16] sm:$0x1]  ;;  %v1526_v7 = vld [vmem:[%s1522_s16 + $0x1] sm:$0x1] }
  0x53   : > { %v980_v58 = vsel %vm629_vm2, 1.0, %v1289_v57  ;;  %v701_v9 = vsel %vm655_vm3, %v1526_v7, 0.0 }
  0x54   : > { %1008 = vmatmul.mubr.msk.f32.gmra.mrb[2].mxu0 %vm404_vm0, %v379_v11  ;;  %512 = vperm.xlu0 %1133, %v508_v12  }
  0xca   : > { %v397_v15 = vpop.permute.xlu1 %396 }
  0xcb   : > { %v387_v14 = vpop.permute.xlu0 %386 }
  0xce   : > { %v402_v21 = vpop.permute.xlu1 %401 }
  0xcf   : > { %v392_v16 = vpop.permute.xlu0 %391 }
  0xd3   : > { %v513_v34 = vpop.permute.xlu0 %512 }
 0x123   : > { %v1006_v17 = vpop.f32.mrb[0].mxu0 }
 0x124   : > { %v489_v18 = vadd.f32 %v1006_v17, %v392_v16  ;;  %v483_v19 = vpop.f32.mrb[1].mxu0  ;;  %v509_v17 = vld [vmem:[%s1633_s6 + $0x8] sm:$0x1] }
 0x125   : > { %v484_v20 = vadd.f32 %v483_v19, %v387_v14 }
 0x126   : > { %1135 = vtanh.f32 %v489_v18 }
 0x127   : > { %1137 = vtanh.f32 %v484_v20  ;;  %v1009_v22 = vpop.f32.mrb[2].mxu0 }
 0x128   : > { %v499_v23 = vadd.f32 %v1009_v22, %v402_v21  ;;  %v493_v24 = vpop.f32.mrb[3].mxu0 }
 0x129   : > { %v494_v25 = vadd.f32 %v493_v24, %v397_v15 }
 0x12a   : > { %1139 = vtanh.f32 %v499_v23 }
 0x12b   : > { %1141 = vtanh.f32 %v494_v25 }
 0x130   : > { %v1136_v26 = vpop.eup %1135 }
 0x131   : > { %v1138_v27 = vpop.eup %1137 }
 0x132   : > { %v1025_v28 = vpack.c.bf16 %v1136_v26, %v1138_v27 }
 0x134   : > { %v1140_v29 = vpop.eup %1139  ;;  %1026 = vmatprep.subr.bf16.mxu1 %v1025_v28 }
 0x135   : > { %v1142_v30 = vpop.eup %1141  ;;  %1028 = vmatpush3.bf16.msra.mxu1 %v1025_v28 }
 0x136   : > { %v1029_v31 = vpack.c.bf16 %v1140_v29, %v1142_v30 }
 0x138   : > { %1030 = vmatprep.subr.bf16.mxu1 %v1029_v31 }
 0x139   : > { %1032 = vmatpush3.bf16.msra.mxu1 %v1029_v31 }
 0x13c   : > { %1019 = vmatmul.mubr.msk.f32.vlgmr.msra.gmra.mrb[0].mxu1 %vm520_vm1, %v507_v32 }
 0x20f   : > { %v1504_v33 = vpop.f32.mrb[0].mxu1 }
 0x210   : > { %v593_v35 = vpop.f32.mrb[1].mxu1 }
 0x211   : > { %v594_v36 = vadd.f32 %v593_v35, %v513_v34 }
 0x213   : > { %v602_v37 = vrot.slane %v594_v36, 4 }
 0x215   : > { %v603_v38 = vmax.f32 %v594_v36, %v602_v37 }
 0x217   : > { %v604_v39 = vrot.slane %v603_v38, 2 }
 0x219   : > { %v605_v40 = vmax.f32 %v603_v38, %v604_v39 }
 0x21b   : > { %v606_v41 = vrot.slane %v605_v40, 1 }
 0x21d   : > { %v607_v42 = vmax.f32 %v605_v40, %v606_v41 }
 0x21f   : > { %v608_v43 = vsub.f32 %v594_v36, %v607_v42 }
 0x221   : > { %v609_v44 = vmul.f32 1.442695, %v608_v43 }
 0x223   : > { %1143 = vpow2.f32 %v609_v44 }
 0x22d   : > { %v1144_v45 = vpop.eup %1143 }
 0x22e   : > { %v611_v46 = vrot.slane %v1144_v45, 4 }
 0x230   : > { %v612_v47 = vadd.f32 %v1144_v45, %v611_v46 }
 0x232   : > { %v613_v48 = vrot.slane %v612_v47, 2 }
 0x234   : > { %v614_v49 = vadd.f32 %v613_v48, %v612_v47 }
 0x236   : > { %v615_v50 = vrot.slane %v614_v49, 1 }
 0x238   : > { %v616_v51 = vadd.f32 %v615_v50, %v614_v49  ;;  %v650_v49 = vld [vmem:[%s1522_s16 + $0x3] sm:$0x1] }
 0x23a   : > { %1145 = vlog2.f32 %v616_v51 }
 0x244   : > { %v1146_v55 = vpop.eup %1145 }
 0x245   : > { %v618_v56 = vmul.f32 0.6931472, %v1146_v55  ;;  %v649_v55 = vld [vmem:[%s1522_s16 + $0x2] sm:$0x1] }
 0x247   : > { %v1516_v59 = vsub.f32 %v608_v43, %v618_v56 }
 0x249   : > { %v632_v60 = vmul.f32 %v980_v58, %v1516_v59 }
 0x24b   : > { %v633_v61 = vrot.slane %v632_v60, 4 }
 0x24d   : > { %v634_v62 = vadd.f32 %v633_v61, %v632_v60 }
 0x24f   : > { %v635_v63 = vrot.slane %v634_v62, 2 }
 0x251   : > { %v636_v0 = vadd.f32 %v635_v63, %v634_v62 }
 0x253   : > { %v637_v1 = vrot.slane %v636_v0, 1 }
 0x255   : > { %v638_v3 = vadd.f32 %v637_v1, %v636_v0 }
 0x257   : > { %v651_v4 = vsub.f32 %v638_v3, %v647_v2 }
 0x259   : > { %v654_v5 = vsub.f32 0.0, %v651_v4  ;;  %v652_v6 = vmul.f32 1.442695, %v651_v4 }
 0x25b   : > { %v656_v8 = vsel %vm655_vm3, %v654_v5, 0.0  ;;  %1147 = vpow2.f32 %v652_v6 }
 0x25c   : > { %657 = vadd.xlane.f32.xlu1 %v656_v8 }
 0x260   : > { %702 = vadd.xlane.f32.xlu1 %v701_v9 }
 0x265   : > { %v1531_v10 = vpop.eup %1147 }
 0x266   : > { %v981_v11 = vadd.f32 -1.0, %v1531_v10 }
 0x268   : > { %v670_v12 = vsub.f32 %v981_v11, %v651_v4  ;;  %v684_v13 = vand.u32 2147483647, %v981_v11 }
 0x26a   : > { %v671_v14 = vsel %vm655_vm3, %v670_v12, 0.0  ;;  %vm685_vm4 = vcmp.gt.f32.partialorder %v684_v13, 0.2 }
 0x26b   : > { %672 = vadd.xlane.f32.xlu0 %v671_v14  ;;  %v982_v15 = vsel %vm685_vm4, 1.0, %v1289_v57 }
 0x26c   : > { %v688_v16 = vsel %vm655_vm3, %v982_v15, 0.0 }
 0x26f   : > { %689 = vadd.xlane.f32.xlu0 %v688_v16  ;;  %v620_v16 = vmul.f32 1.442695, %v1516_v59 }
 0x271   : > { %517 = vperm.xlu1 %1134, %v509_v17  }
 0x2e9   : > { %v658_v18 = vpop.xlane.xlu1 %657 }
 0x2ea   : > { %v659_v19 = vrot.slane %v658_v18, 4 }
 0x2ec   : > { %v660_v20 = vadd.f32 %v659_v19, %v658_v18 }
 0x2ed   : > { %v703_v24 = vpop.xlane.xlu1 %702 }
 0x2ee   : > { %v661_v21 = vrot.slane %v660_v20, 2  ;;  %v704_v25 = vrot.slane %v703_v24, 4 }
 0x2f0   : > { %v662_v22 = vadd.f32 %v661_v21, %v660_v20  ;;  %v705_v27 = vadd.f32 %v704_v25, %v703_v24  ;;  %v745_v24 = vmax.f32 %v1531_v10, 0.8 }
 0x2f1   : > { %v518_v47 = vpop.permute.xlu1 %517 }
 0x2f2   : > { %v663_v23 = vrot.slane %v662_v22, 1  ;;  %v706_v31 = vrot.slane %v705_v27, 2  ;;  %v599_v48 = vadd.f32 %v1504_v33, %v518_v47 }
 0x2f4   : > { %v664_v26 = vadd.f32 %v663_v23, %v662_v22  ;;  %v707_v38 = vadd.f32 %v706_v31, %v705_v27  ;;  %v764_v50 = vsub.f32 %v599_v48, %v650_v49  ;;  %v762_v57 = vsub.f32 %v599_v48, %v649_v55 }
 0x2f6   : > { %1033 = vpush %v664_v26  ;;  %v708_v43 = vrot.slane %v707_v38, 1  ;;  %v765_v51 = vmax.f32 %v764_v50, 0.2  ;;  %v763_v61 = vmul.f32 %v762_v57, %v762_v57 }
 0x2f8   : > { %v673_v28 = vpop.xlane.xlu0 %672  ;;  %v709_v46 = vadd.f32 %v708_v43, %v707_v38  ;;  %v766_v52 = vmin.f32 %v765_v51, 0.2 }
 0x2f9   : > { %v674_v29 = vrot.slane %v673_v28, 4 }
 0x2fa   : > { %v767_v54 = vadd.f32 %v766_v52, %v650_v49 }
 0x2fb   : > { %v675_v30 = vadd.f32 %v674_v29, %v673_v28  ;;  %v746_v29 = vmin.f32 %v745_v24, 1.2 }
 0x2fc   : > { %v690_v32 = vpop.xlane.xlu0 %689  ;;  %v768_v56 = vsub.f32 %v767_v54, %v649_v55 }
 0x2fd   : > { %v676_v34 = vrot.slane %v675_v30, 2  ;;  %v691_v35 = vrot.slane %v690_v32, 4 }
 0x2fe   : > { %v769_v33 = vmul.f32 %v768_v56, %v768_v56 }
 0x2ff   : > { %v692_v36 = vadd.f32 %v691_v35, %v690_v32  ;;  %v677_v37 = vadd.f32 %v676_v34, %v675_v30 }
 0x300   : > { %v770_v0 = vmax.f32 %v763_v61, %v769_v33 }
 0x301   : > { %v693_v39 = vrot.slane %v692_v36, 2  ;;  %v678_v40 = vrot.slane %v677_v37, 1 }
 0x302   : > { %v771_v1 = vsel %vm655_vm3, %v770_v0, 0.0 }
 0x303   : > { %v679_v41 = vadd.f32 %v678_v40, %v677_v37  ;;  %v694_v42 = vadd.f32 %v693_v39, %v692_v36 }
 0x305   : > { %1035 = vpush %v679_v41  ;;  %v695_v44 = vrot.slane %v694_v42, 1 }
 0x307   : > { %v696_v45 = vadd.f32 %v695_v44, %v694_v42 }
 0x309   : > { %1037 = vpush %v696_v45 }
 0x30a   : > { %1039 = vpush %v709_v46 }
 0x327   : > { %s1541_s18 = spop %1033 }
 0x328   : > { %s668_s24 = smul.f32 0.0078125, %s1541_s18 }
 0x336   : > { %s1543_s11 = spop %1035 }
 0x337   : > { %s683_s16 = smul.f32 0.0078125, %s1543_s11 }
 0x33a   : > { %s1546_s2 = spop %1037 }
 0x33b   : > { %s1040_s19 = spop %1039  ;;  %s700_s0 = smul.f32 0.0078125, %s1546_s2 }
 0x33c   : > { %s713_s12 = smul.f32 0.0078125, %s1040_s19  ;;  %s969_s19 = sshll.u32 %s1457_s15, 3 }
 0x33e   : > { %v714_v58 = vstv %s713_s12 }
 0x33f   : > { %v715_v60 = vsub.f32 %v1526_v7, %v714_v58 }
 0x341   : > { %v716_v62 = vmul.f32 %v715_v60, %v715_v60 }
 0x343   : > { %v717_v63 = vsel %vm655_vm3, %v716_v62, 0.0 }
 0x344   : > { %718 = vadd.xlane.f32.xlu0 %v717_v63  ;;  %v812_v63 = vstv %s668_s24 }
 0x348   : > { %772 = vadd.xlane.f32.xlu0 %v771_v1  ;;  %v815_v1 = vstv %s683_s16  ;;  %s825_s16 = scalar_lea.sflag [#allocation4], %s1457_s15 }
 0x3d1   : > { %v719_v2 = vpop.xlane.xlu0 %718 }
 0x3d2   : > { %v720_v3 = vrot.slane %v719_v2, 4 }
 0x3d4   : > { %v721_v4 = vadd.f32 %v720_v3, %v719_v2  ;;  %v818_v3 = vstv %s700_s0 }
 0x3d5   : > { %v773_v37 = vpop.xlane.xlu0 %772 }
 0x3d6   : > { %v722_v5 = vrot.slane %v721_v4, 2  ;;  %v774_v38 = vrot.slane %v773_v37, 4 }
 0x3d8   : > { %v723_v6 = vadd.f32 %v722_v5, %v721_v4  ;;  %v775_v39 = vadd.f32 %v774_v38, %v773_v37 }
 0x3da   : > { %v724_v8 = vrot.slane %v723_v6, 1  ;;  %v776_v40 = vrot.slane %v775_v39, 2 }
 0x3dc   : > { %v725_v9 = vadd.f32 %v724_v8, %v723_v6  ;;  %v777_v45 = vadd.f32 %v776_v40, %v775_v39 }
 0x3de   : > { %1041 = vpush %v725_v9  ;;  %v778_v49 = vrot.slane %v777_v45, 1 }
 0x3e0   : > { %v779_v55 = vadd.f32 %v778_v49, %v777_v45 }
 0x40f   : > { %s1042_s23 = spop %1041 }
 0x410   : > { %s729_s7 = smul.f32 0.007874016, %s1042_s23  ;;  %s984_s23 = sshll.u32 %s1271_s28, 2 }
 0x411   : > { %s836_s11 = sadd.s32 %s1267_s27, %s984_s23 }
 0x412   : > { %v730_v7 = vstv %s729_s7  ;;  %s985_s2 = sshll.u32 %s836_s11, 7 }
 0x413   : > { %1149 = vrsqrt.f32 %v730_v7  ;;  %vm733_vm5 = vcmp.eq.f32.partialorder %v730_v7, inf  ;;  %v736_v13 = vand.u32 2147483648, %v730_v7  ;;  %vm735_vm6 = vcmp.eq.f32.partialorder %v730_v7, 0.0 }
 0x414   : > { %1151 = vpow2.f32 %v620_v16 }
 0x41d   : > { %v1150_v11 = vpop.eup %1149 }
 0x41e   : > { %v732_v12 = vmul.f32 %v1150_v11, %v730_v7  ;;  %v1152_v17 = vpop.eup %1151 }
 0x41f   : > { %v639_v18 = vmul.f32 %v1152_v17, %v1516_v59 }
 0x420   : > { %v734_v14 = vsel %vm733_vm5, %v730_v7, %v732_v12 }
 0x421   : > { %v737_v15 = vsel %vm735_vm6, %v736_v13, %v734_v14  ;;  %v640_v19 = vrot.slane %v639_v18, 4 }
 0x422   : > { %1043 = vpush %v737_v15 }
 0x423   : > { %v641_v21 = vadd.f32 %v640_v19, %v639_v18 }
 0x425   : > { %v642_v22 = vrot.slane %v641_v21, 2 }
 0x427   : > { %v643_v23 = vadd.f32 %v642_v22, %v641_v21 }
 0x429   : > { %v644_v27 = vrot.slane %v643_v23, 1 }
 0x42b   : > { %v645_v32 = vadd.f32 %v644_v27, %v643_v23 }
 0x42d   : > { %v646_v35 = vsub.f32 0.0, %v645_v32 }
 0x42f   : > { %v785_v36 = vsel %vm655_vm3, %v646_v35, 0.0 }
 0x453   : > { %s1044_s10 = spop %1043 }
 0x454   : > { %s739_s13 = sadd.f32 1e-08, %s1044_s10 }
 0x456   : > { %v740_v20 = vstv %s739_s13 }
 0x457   : > { %1153 = vrcp.f32 %v740_v20 }
 0x461   : > { %v1154_v25 = vpop.eup %1153 }
 0x462   : > { %v742_v26 = vmul.f32 %v1154_v25, %v715_v60 }
 0x464   : > { %v743_v28 = vsub.f32 0.0, %v742_v26 }
 0x466   : > { %v744_v30 = vmul.f32 %v1531_v10, %v743_v28  ;;  %v747_v31 = vmul.f32 %v746_v29, %v743_v28 }
 0x468   : > { %v748_v59 = vmax.f32 %v744_v30, %v747_v31 }
 0x46a   : > { %v749_v34 = vsel %vm655_vm3, %v748_v59, 0.0 }
 0x46b   : > { %750 = vadd.xlane.f32.xlu0 %v749_v34 }
 0x46f   : > { %786 = vadd.xlane.f32.xlu0 %v785_v36 }
 0x4f8   : > { %v751_v41 = vpop.xlane.xlu0 %750 }
 0x4f9   : > { %v752_v42 = vrot.slane %v751_v41, 4 }
 0x4fb   : > { %v753_v43 = vadd.f32 %v752_v42, %v751_v41 }
 0x4fc   : > { %v787_v44 = vpop.xlane.xlu0 %786 }
 0x4fd   : > { %v754_v10 = vrot.slane %v753_v43, 2  ;;  %v788_v46 = vrot.slane %v787_v44, 4 }
 0x4ff   : > { %v789_v47 = vadd.f32 %v788_v46, %v787_v44  ;;  %v755_v48 = vadd.f32 %v754_v10, %v753_v43 }
 0x501   : > { %v790_v50 = vrot.slane %v789_v47, 2  ;;  %v756_v51 = vrot.slane %v755_v48, 1 }
 0x503   : > { %v791_v52 = vadd.f32 %v790_v50, %v789_v47  ;;  %v757_v54 = vadd.f32 %v756_v51, %v755_v48 }
 0x505   : > { %1045 = vpush %v757_v54  ;;  %v792_v56 = vrot.slane %v791_v52, 1 }
 0x506   : > { %1047 = vpush %v779_v55 }
 0x507   : > { %v793_v57 = vadd.f32 %v792_v56, %v791_v52 }
 0x509   : > { %1049 = vpush %v793_v57 }
 0x536   : > { %s1046_s21 = spop %1045 }
 0x537   : > { %s1048_s9 = spop %1047  ;;  %s761_s12 = smul.f32 0.0078125, %s1046_s21 }
 0x538   : > { %s781_s14 = smul.f32 0.5, %s1048_s9  ;;  %s358_s9 = scalar_lea.vmem [#allocation5], %s969_s19 }
 0x539   : > { %v806_v60 = vstv %s761_s12  ;;  %s1290_s19 = smov [#allocation5]  }
 0x53a   : > { %s784_s7 = smul.f32 0.0078125, %s781_s14  ;;  %s1050_s10 = spop %1049 }
 0x53b   : > { %s797_s13 = smul.f32 0.0078125, %s1050_s10  ;;  %s840_s14 = sshll.u32 %s358_s9, 4  ;;  %s1575_s14 = int_to_ptr.vmem [resolvable:$true] %s840_s14 }
 0x53c   : > { %v803_v58 = vstv %s784_s7  ;;  %s800_s28 = smul.f32 0.5, %s784_s7  ;;  %s1185_s0 = scalar_lea.vmem %s1575_s14, 128 }
 0x53d   : > { %v804_v33 = vsel %vm802_vm7, %v803_v58, 0.0  ;;  %s798_s18 = smul.f32 0.01, %s797_s13  ;;  %v809_v61 = vstv %s797_s13  ;;  %p1186_p12 = scmp.ne.s32.totalorder %s1575_s14, %s1185_s0 }
 0x53e   : > { %v807_v62 = vsel %vm805_vm8, %v806_v60, %v804_v33  ;;  %s1189_s7 = sshll.u32 %s1290_s19, 4  ;;  %s1190_s7 = int_to_ptr.vmem [resolvable:$false] %s1189_s7 }
 0x53f   : > { %s799_s21 = ssub.f32 %s761_s12, %s798_s18  ;;  %v810_v0 = vsel %vm808_vm9, %v809_v61, %v807_v62  ;;  %s1653_s12 = sld [smem:[#allocation13_spill]] }
 0x540   : > { %v813_v2 = vsel %vm811_vm10, %v812_v63, %v810_v0  ;;  %p1187_p11 = pnand %p1186_p12, %p1654_p0  ;;  %s1191_s13 = scalar_lea.vmem %s1190_s7, 256 }
 0x541   : > { %s801_s10 = sadd.f32 %s800_s28, %s799_s21  ;;  %v816_v4 = vsel %vm814_vm11, %v815_v1, %v813_v2  ;;  %p1192_p1 = scmp.lt.s32.totalorder %s1575_s14, %s1190_s7 }
 0x542   : > { %v819_v5 = vsel %vm817_vm12, %v818_v3, %v816_v4  ;;  %p1188_p13 = pneg %p1187_p11  ;;  %p1193_p3 = scmp.lt.s32.totalorder %s1191_s13, %s1185_s0 }
 0x543   : > { %v821_v6 = vstv %s801_s10 }
 0x544   : > { %v822_v8 = vsel %vm820_vm13, %v821_v6, %v819_v5  ;;  %p1194_p5 = por %p1193_p3, %p1192_p1 }
 0x545   : > { %s1573_s23 = scalar_lea.hbm %s1653_s12, %s985_s2  ;;  %823 = vst [vmem:[%s358_s9] sm:$0xff] %v822_v8 }
 0x546   : > { %p1195_p6 = pnand %p1194_p5, %p1188_p13 }
 0x548   : > { %1198 = shalt.err (!%p1195_p6)
}
 0x549   : > { %s1199_s15 = scalar_lea.hbm %s1573_s23, 128  ;;  %s1203_s28 = scalar_lea.hbm %s1653_s12, 1024 }
 0x54a   : > { %p1200_p7 = scmp.ne.s32.totalorder %s1573_s23, %s1199_s15  ;;  %p1204_p10 = scmp.lt.u32.totalorder %s1573_s23, %s1653_s12 }
 0x54b   : > { %p1205_p8 = scmp.lt.u32.totalorder %s1203_s28, %s1199_s15  ;;  %p1207_p12 = scmp.lt.u32.totalorder %s1199_s15, %s1573_s23 }
 0x54c   : > { %p1201_p2 = pnand %p1200_p7, %p1654_p0 }
 0x54d   : > { %p1206_p9 = por %p1205_p8, %p1204_p10 }
 0x54e   : > { %p1202_p4 = pneg %p1201_p2 }
 0x54f   : > { %p1208_p11 = por %p1207_p12, %p1206_p9 }
 0x551   : > { %p1209_p13 = pnand %p1208_p11, %p1202_p4 }
 0x553   : > { %1212 = shalt.err (!%p1209_p13)
}
 0x554   : > { %1053 = dma.vmem_to_hbm [thread:$0]  (%p1654_p0), %s1575_s14, 128, %s1573_s23, %s825_s16  }
 0x555 PF: > { %s1655_s9 = sld [smem:[#allocation8_spill]]  ;;  %p1064_p1 = scmp.ge.s32.totalorder %s1283_s8, 2 }
 0x556   : > { %p1656_p3 = scmp.ne.s32.totalorder %s1649_s20, 0 }
 0x558   : > { %p1060_p5 = pnand %p1064_p1, %p1656_p3 }
 0x55b   : > { %s852_s10 = sand.u32 1, %s1655_s9  }
 0x55c   : > { %s853_s27 = scalar_lea.sflag [#allocation4], %s852_s10 }
 0x55d   : > { %1250 = dma.done.wait (!%p1060_p5), %s853_s27, 128  }
 0x55e   : > { %1252 = vsyncadd (!%p1060_p5), %s853_s27, 4294967168  ;;  %s23_s8 = sadd.s32 1, %s1283_s8   ;;  %s1657_s17 = sld [smem:[#allocation9_spill]] }
 0x55f   : > { %p20_p6 = scmp.ge.s32.totalorder %s23_s8, 10   ;;  %s1658_s14 = sld [smem:[#allocation10_spill]] }
 0x560   : > { %s1659_s24 = smov %s1259_s25  ;;  %s1660_s25 = smov %s1263_s26 }
 0x561   : > { %s1661_s26 = smov %s1409_s22  ;;  %s1662_s27 = smov %s1275_s29 }
 0x562   : > { %s1663_s28 = smov %s1279_s30  ;;  %22 = sbr.rel (!%p20_p6) target bundleno = 11 (0xb), region = 99 }
 0x564   : > { %s1664_s29 = smov %s1657_s17 }
 0x565   : > { %s1665_s30 = smov %s1658_s14 }
 0x569   :  { %858 = vsyncpa [#allocation3], 1 }
 0x56a   :  { %860 = vsyncpa [#allocation3 + $0x1], 1 }
 0x56b   :  { %861 = vsyncpa [#allocation4], 1 }
 0x56c   :  { %863 = vsyncpa [#allocation4 + $0x1], 1 }

</bundles_post_ra>
